<compile_context>
chip_gen: v7x
topology: tpu7x:2x2x1
jax: 0.10.0
libtpu: 0.0.40
codegen_flags: <defaults>
</compile_context>

<pallas_src>
import jax
import jax.numpy as jnp
from jax import lax
from jax.experimental import pallas as pl
from jax.experimental.pallas import tpu as pltpu

GAUS_DIM = 1
HIDDEN_DIM = 25
OUT_DIM = 2 * GAUS_DIM
NEG_SLOPE = 0.01  # torch.nn.functional.leaky_relu default

_LANE = 128
_SUBLANE = 8
_DEFAULT_SCOPED_VMEM = 32 * 1024 * 1024  # default scoped-VMEM limit (all gens)


def _round_up(x: int, m: int) -> int:
    return ((x + m - 1) // m) * m


def _vmem_bytes(tb: int, d_in: int) -> int:
    """Lane-padded VMEM footprint of one pipelined grid step:
    double-buffered in/out tiles + resident hidden temporary + resident params."""
    x_tile = tb * _round_up(d_in, _LANE) * 4              # (tb, d_in): lanes pad to 128
    out_tile = _round_up(OUT_DIM, _SUBLANE) * tb * 4      # (2, tb): lane-dense
    hid_tile = _round_up(HIDDEN_DIM, _SUBLANE) * tb * 4   # (25, tb): lane-dense temp
    params = 4 * _round_up(HIDDEN_DIM, _SUBLANE) * _LANE * 4  # tiny resident weights
    return 2 * (x_tile + out_tile) + hid_tile + params


def _gaus_linear_kernel(x_ref, w_ref, b_ref, wf_ref, bf_ref, out_ref):
    """One batch tile, batch-in-lanes on the hidden/output side.

    x_ref:  (tb, d_in)      w_ref: (d_in, H)     b_ref:  (H, 1)
    wf_ref: (2, H) [=Wf^T]  bf_ref: (2, 1)       out_ref: (2, tb)

    hT (H, tb)  = W_cat^T @ x^T + b_sum   (via dot_general, no explicit transpose)
    hT          = leaky_relu(hT)
    out (2, tb) = Wf^T @ hT + bf          (lane-dense store)
    """
    hT = lax.dot_general(
        w_ref[...], x_ref[...],
        dimension_numbers=(((0,), (1,)), ((), ())),       # contract d_in with d_in
        preferred_element_type=jnp.float32) + b_ref[...]
    hT = jnp.maximum(hT, NEG_SLOPE * hT)                  # leaky_relu
    out_ref[...] = (jnp.dot(wf_ref[...], hT, preferred_element_type=jnp.float32)
                    + bf_ref[...]).astype(out_ref.dtype)


def gaus_linear_forward(parent_vals, params, *, tile_b: int = 8192):
    """parent_vals: list of (B, in_dim_i) f32 arrays.
    params: dict with 'Ws' (list of (in_dim_i, HIDDEN_DIM)), 'bs' (list of (HIDDEN_DIM,)),
            'Wf' (HIDDEN_DIM, 2*GAUS_DIM), 'bf' (2*GAUS_DIM,).
    Returns (B, 2, GAUS_DIM) f32, matching the PyTorch forward."""
    xs = [jnp.asarray(v, jnp.float32) for v in parent_vals]
    x_cat = jnp.concatenate(xs, axis=1)                                   # (B, D_in)
    w_cat = jnp.concatenate(
        [jnp.asarray(w, jnp.float32) for w in params["Ws"]], axis=0)      # (D_in, H)
    b_sum = sum(jnp.asarray(b, jnp.float32)
                for b in params["bs"]).reshape(HIDDEN_DIM, 1)             # (H, 1)
    wf_t = jnp.asarray(params["Wf"], jnp.float32).T                       # (2, H)
    bf = jnp.asarray(params["bf"], jnp.float32).reshape(OUT_DIM, 1)       # (2, 1)

    batch, d_in = x_cat.shape

    # --- batch tile selection -------------------------------------------------
    # tb must be a multiple of 128 so the lane-dense (OUT_DIM, tb) output block
    # is legal. Aim for >= 2 grid steps when the batch allows it, so the
    # "parallel" batch axis can shard across both TensorCores on v7x.
    tb_cap = _round_up(batch, _LANE)
    if batch > 2 * _LANE:
        tb_cap = _round_up(-(-batch // 2), _LANE)          # ceil(batch/2), lane-rounded
    tb = max(_LANE, min(_round_up(tile_b, _LANE), tb_cap))
    b_pad = _round_up(batch, tb)
    if b_pad != batch:
        x_cat = jnp.pad(x_cat, ((0, b_pad - batch), (0, 0)))

    # --- VMEM accounting (lane-padded); bump scoped limit only if needed ------
    vmem_est = _vmem_bytes(tb, d_in)
    compiler_kwargs = dict(dimension_semantics=("parallel",))   # megacore on v7x
    if vmem_est > _DEFAULT_SCOPED_VMEM:
        # Caller-supplied very large tiles: raise the scoped limit with headroom.
        # (Stay under physical VMEM: 64 MiB/TC on v7x, 128 MiB on v5e/v6e.)
        compiler_kwargs["vmem_limit_bytes"] = int(vmem_est * 1.25)

    grid = (b_pad // tb,)
    const_block = lambda i: (0, 0)   # tiny params: same block every step (resident)

    out_t = pl.pallas_call(
        _gaus_linear_kernel,
        out_shape=jax.ShapeDtypeStruct((OUT_DIM, b_pad), jnp.float32),
        grid=grid,
        in_specs=[
            pl.BlockSpec((tb, d_in), lambda i: (i, 0)),          # x tile (pipelined)
            pl.BlockSpec((d_in, HIDDEN_DIM), const_block),       # W_cat
            pl.BlockSpec((HIDDEN_DIM, 1), const_block),          # b_sum (column)
            pl.BlockSpec((OUT_DIM, HIDDEN_DIM), const_block),    # Wf^T
            pl.BlockSpec((OUT_DIM, 1), const_block),             # bf (column)
        ],
        out_specs=pl.BlockSpec((OUT_DIM, tb), lambda i: (0, i)), # lane-dense output
        compiler_params=pltpu.CompilerParams(**compiler_kwargs),
    )(x_cat, w_cat, b_sum, wf_t, bf)

    # (2, B_pad) -> slice -> (B, 2) -> (B, 2, GAUS_DIM): tiny layout glue in JAX.
    return out_t[:, :batch].T.reshape(-1, 2, GAUS_DIM)


def init_params(key, parent_dims):
    """Deterministic init mimicking torch.nn.Linear (uniform +-1/sqrt(fan_in))."""
    keys = jax.random.split(key, 2 * len(parent_dims) + 2)
    Ws, bs = [], []
    for i, in_dim in enumerate(parent_dims):
        bound = 1.0 / jnp.sqrt(in_dim)
        Ws.append(jax.random.uniform(keys[2 * i], (in_dim, HIDDEN_DIM),
                                     jnp.float32, -bound, bound))
        bs.append(jax.random.uniform(keys[2 * i + 1], (HIDDEN_DIM,),
                                     jnp.float32, -bound, bound))
    bound_f = 1.0 / jnp.sqrt(HIDDEN_DIM)
    Wf = jax.random.uniform(keys[-2], (HIDDEN_DIM, OUT_DIM),
                            jnp.float32, -bound_f, bound_f)
    bf = jax.random.uniform(keys[-1], (OUT_DIM,),
                            jnp.float32, -bound_f, bound_f)
    return {"Ws": Ws, "bs": bs, "Wf": Wf, "bf": bf}


def reference_forward(parent_vals, params):
    """Pure-JAX reference of the PyTorch semantics (per-parent Linears, summed)."""
    h = None
    for x, W, b in zip(parent_vals, params["Ws"], params["bs"]):
        hi = x @ W + b
        h = hi if h is None else h + hi
    h = jnp.where(h >= 0, h, NEG_SLOPE * h)
    out = h @ params["Wf"] + params["bf"]
    return out.reshape(-1, 2, GAUS_DIM)


if __name__ == "__main__":
    parent_dims = [4, 6]     # two parents with feature dims 4 and 6
    key = jax.random.PRNGKey(0)
    k_params, k_x0, k_x1 = jax.random.split(key, 3)
    params = init_params(k_params, parent_dims)

    # --- small shape check (single tile) ---
    batch = 8
    x0 = jax.random.normal(k_x0, (batch, parent_dims[0]), jnp.float32)
    x1 = jax.random.normal(k_x1, (batch, parent_dims[1]), jnp.float32)
    parent_vals = [x0, x1]

    out = gaus_linear_forward(parent_vals, params)
    out = jax.block_until_ready(out)
    ref = reference_forward(parent_vals, params)
    assert out.shape == (batch, 2, GAUS_DIM), out.shape
    assert jnp.allclose(out, ref, atol=1e-5, rtol=1e-5), "mismatch vs reference (small)"

    # --- multi-tile / padded-batch check (exercises the pipelined grid path) ---
    batch2 = 300
    k_a, k_b = jax.random.split(jax.random.PRNGKey(1))
    y0 = jax.random.normal(k_a, (batch2, parent_dims[0]), jnp.float32)
    y1 = jax.random.normal(k_b, (batch2, parent_dims[1]), jnp.float32)
    out2 = jax.block_until_ready(
        gaus_linear_forward([y0, y1], params, tile_b=256))
    ref2 = reference_forward([y0, y1], params)
    assert out2.shape == (batch2, 2, GAUS_DIM), out2.shape
    assert jnp.allclose(out2, ref2, atol=1e-5, rtol=1e-5), "mismatch vs reference (tiled)"

    print("KERNEL_OK")
</pallas_src>

<mosaic_0001>
module attributes {stable_mosaic.version = 11 : i64} {
  func.func @_gaus_linear_kernel(%arg0: i32, %arg1: memref<128x10xf32, #tpu.memory_space<vmem>>, %arg2: memref<10x25xf32, #tpu.memory_space<vmem>>, %arg3: memref<25x1xf32, #tpu.memory_space<vmem>>, %arg4: memref<2x25xf32, #tpu.memory_space<vmem>>, %arg5: memref<2x1xf32, #tpu.memory_space<vmem>>, %arg6: memref<2x128xf32, #tpu.memory_space<vmem>>) attributes {dimension_semantics = [#tpu.dimension_semantics<parallel>], iteration_bounds = array<i64: 1>, scalar_prefetch = 0 : i64, scratch_operands = 0 : i64, tpu.core_type = #tpu.core_type<tc>, window_params = [{transform_indices = @transform_0, window_bounds = array<i64: 128, 10>}, {pipeline_mode = #tpu.pipeline_mode<synchronous>, transform_indices = @transform_1, window_bounds = array<i64: 10, 25>}, {pipeline_mode = #tpu.pipeline_mode<synchronous>, transform_indices = @transform_2, window_bounds = array<i64: 25, 1>}, {pipeline_mode = #tpu.pipeline_mode<synchronous>, transform_indices = @transform_3, window_bounds = array<i64: 2, 25>}, {pipeline_mode = #tpu.pipeline_mode<synchronous>, transform_indices = @transform_4, window_bounds = array<i64: 2, 1>}, {transform_indices = @transform_5, window_bounds = array<i64: 2, 128>}]} {
    %c0 = arith.constant 0 : index
    %c0_0 = arith.constant 0 : index
    %0 = vector.load %arg2[%c0, %c0_0] : memref<10x25xf32, #tpu.memory_space<vmem>>, vector<10x25xf32>
    %c0_1 = arith.constant 0 : index
    %c0_2 = arith.constant 0 : index
    %1 = vector.load %arg1[%c0_1, %c0_2] : memref<128x10xf32, #tpu.memory_space<vmem>>, vector<128x10xf32>
    %cst = arith.constant dense<0.000000e+00> : vector<25x128xf32>
    %2 = tpu.matmul %0, %1, %cst {dimension_numbers = #tpu.dot_dimension_numbers<[0], [1], [1], [0], [0, 1, 1, 0], [], []>} : vector<10x25xf32>, vector<128x10xf32>, vector<25x128xf32> -> vector<25x128xf32>
    %c0_3 = arith.constant 0 : index
    %c0_4 = arith.constant 0 : index
    %3 = vector.load %arg3[%c0_3, %c0_4] : memref<25x1xf32, #tpu.memory_space<vmem>>, vector<25x1xf32>
    %4 = vector.broadcast %3 : vector<25x1xf32> to vector<25x128xf32>
    %5 = arith.addf %2, %4 : vector<25x128xf32>
    %cst_5 = arith.constant 0.00999999977 : f32
    %6 = vector.broadcast %cst_5 : f32 to vector<25x128xf32>
    %7 = arith.mulf %6, %5 : vector<25x128xf32>
    %8 = arith.maximumf %5, %7 : vector<25x128xf32>
    %c0_6 = arith.constant 0 : index
    %c0_7 = arith.constant 0 : index
    %9 = vector.load %arg4[%c0_6, %c0_7] : memref<2x25xf32, #tpu.memory_space<vmem>>, vector<2x25xf32>
    %cst_8 = arith.constant dense<0.000000e+00> : vector<2x128xf32>
    %10 = tpu.matmul %9, %8, %cst_8 {dimension_numbers = #tpu.dot_dimension_numbers<[1], [0], [0], [1], [0, 0, 1, 1], [], []>} : vector<2x25xf32>, vector<25x128xf32>, vector<2x128xf32> -> vector<2x128xf32>
    %c0_9 = arith.constant 0 : index
    %c0_10 = arith.constant 0 : index
    %11 = vector.load %arg5[%c0_9, %c0_10] : memref<2x1xf32, #tpu.memory_space<vmem>>, vector<2x1xf32>
    %12 = vector.broadcast %11 : vector<2x1xf32> to vector<2x128xf32>
    %13 = arith.addf %10, %12 : vector<2x128xf32>
    %c0_11 = arith.constant 0 : index
    %c0_12 = arith.constant 0 : index
    %14 = vector.load %arg6[%c0_11, %c0_12] : memref<2x128xf32, #tpu.memory_space<vmem>>, vector<2x128xf32>
    tpu.vector_store %arg6[%c0_11, %c0_12], %13 {strides = array<i32>} : memref<2x128xf32, #tpu.memory_space<vmem>>, vector<2x128xf32>,
    return
  }
  func.func @transform_0(%arg0: i32) -> (i32, i32) {
    %c0_i32 = arith.constant 0 : i32
    %c0_i32_0 = arith.constant 0 : i32
    return %arg0, %c0_i32 : i32, i32
  }
  func.func @transform_1(%arg0: i32) -> (i32, i32) {
    %c0_i32 = arith.constant 0 : i32
    %c0_i32_0 = arith.constant 0 : i32
    %c0_i32_1 = arith.constant 0 : i32
    return %c0_i32, %c0_i32_0 : i32, i32
  }
  func.func @transform_2(%arg0: i32) -> (i32, i32) {
    %c0_i32 = arith.constant 0 : i32
    %c0_i32_0 = arith.constant 0 : i32
    %c0_i32_1 = arith.constant 0 : i32
    return %c0_i32, %c0_i32_0 : i32, i32
  }
  func.func @transform_3(%arg0: i32) -> (i32, i32) {
    %c0_i32 = arith.constant 0 : i32
    %c0_i32_0 = arith.constant 0 : i32
    %c0_i32_1 = arith.constant 0 : i32
    return %c0_i32, %c0_i32_0 : i32, i32
  }
  func.func @transform_4(%arg0: i32) -> (i32, i32) {
    %c0_i32 = arith.constant 0 : i32
    %c0_i32_0 = arith.constant 0 : i32
    %c0_i32_1 = arith.constant 0 : i32
    return %c0_i32, %c0_i32_0 : i32, i32
  }
  func.func @transform_5(%arg0: i32) -> (i32, i32) {
    %c0_i32 = arith.constant 0 : i32
    %c0_i32_0 = arith.constant 0 : i32
    return %c0_i32, %arg0 : i32, i32
  }
}

</mosaic_0001>

<bundles_post_ra>
// kernel: tpu_custom_call.1
= control target key start
LH: loop header
LB: loop body
LE: loop exit
PB: predicated region body
PF: predicated region fallthrough
CT: control target
= control target key end

     0   :  { %vm95_vm0 = vcmask 80896   ;;  %s694_s0 = inlined_call_operand.vmem [shape: f32[128,10], index: 0, kind: input, shape index: {}]   ;;  %s695_s1 = inlined_call_operand.vmem [shape: f32[10,25], index: 1, kind: input, shape index: {}]   ;;  %s696_s2 = inlined_call_operand.vmem [shape: f32[25,1], index: 2, kind: input, shape index: {}]   ;;  %s697_s3 = inlined_call_operand.vmem [shape: f32[2,25], index: 3, kind: input, shape index: {}]   ;;  %s698_s4 = inlined_call_operand.vmem [shape: f32[2,1], index: 4, kind: input, shape index: {}]   ;;  %s699_s5 = inlined_call_operand.hbm [shape: f32[2,128], index: 5, kind: output, shape index: {}]  }
   0x1   :  { %v21_v0 = vld [vmem:[%s695_s1] sm:$0xff]  ;;  %v24_v2 = vld [vmem:[%s694_s0 + $0x8] sm:$0xff]  ;;  %vm579_vm1 = vmpackc.low %vm95_vm0, %vm95_vm0 }
   0x2   :  { %v23_v1 = vld [vmem:[%s694_s0] sm:$0xff]  ;;  %63 = vxpose.xlu0.b32.start [1/2] (short) (narrow) %v21_v0, 32  ;;  %v25_v4 = vld [vmem:[%s694_s0 + $0x10] sm:$0xff]  ;;  %v22_v5 = vld [vmem:[%s695_s1 + $0x8] sm:$0x3] }
   0x3   :  { %v445_v6 = vpack.c.bf16 %v24_v2, %v23_v1  ;;  %v26_v7 = vld [vmem:[%s694_s0 + $0x18] sm:$0xff] }
   0x4   :  { %v451_v8 = vpack.c.bf16 %v26_v7, %v25_v4 }
   0x5   :  { %447 = vmatprep.subr.msk.bf16.mxu0 %vm579_vm1, %v445_v6 }
   0x6   :  { %64 = vxpose.xlu0.b32.end [2/2] (short) (narrow) %v22_v5, 32  ;;  %450 = vmatpush3.bf16.xpose.msk.msra.mxu0 %vm579_vm1, %v445_v6 }
   0x7   :  { %453 = vmatprep.subr.msk.bf16.mxu0 %vm579_vm1, %v451_v8 }
   0x8   :  { %10 = vsyncpa [#allocation3], 0  ;;  %v27_v9 = vld [vmem:[%s694_s0 + $0x20] sm:$0xff]  ;;  %v28_v10 = vld [vmem:[%s694_s0 + $0x28] sm:$0xff]  ;;  %v532_v15 = vmov 0   ;;  %v533_v37 = vmov 0.0|0.0  }
   0x9   :  { %v457_v11 = vpack.c.bf16 %v28_v10, %v27_v9  ;;  %v39_v12 = vld [vmem:[%s696_s2] sm:$0xff]  ;;  %v29_v13 = vld [vmem:[%s694_s0 + $0x30] sm:$0xff]  ;;  %v30_v14 = vld [vmem:[%s694_s0 + $0x38] sm:$0xff]  ;;  %506 = vset.pattern.permute.xlu1 %v532_v15  ;;  %493 = vmatprep.subr.bf16.mxu1 %v533_v37  ;;  %vm534_vm2 = vmmov 0   ;;  %v535_v38 = vmov 0.0   ;;  %vm260_vm3 = vcmask 1040384  }
   0xa   :  { %45 = vperm.xlu1 %506, %v39_v12   ;;  %v40_v16 = vld [vmem:[%s696_s2 + $0x8] sm:$0xff]  ;;  %v463_v17 = vpack.c.bf16 %v30_v14, %v29_v13  ;;  %v42_v18 = vld [vmem:[%s696_s2 + $0x18] sm:$0x1]  ;;  %v31_v19 = vld [vmem:[%s694_s0 + $0x40] sm:$0xff]  ;;  %442 = vmatprep.mubr.msk.f32.mxu1 %vm534_vm2, %v535_v38  ;;  %vm536_vm4 = vmmov 1   ;;  %vm256_vm6 = vcmask 203776  }
   0xb   :  { %v32_v20 = vld [vmem:[%s694_s0 + $0x48] sm:$0xff]  ;;  %v250_v21 = vld [vmem:[%s698_s4] sm:$0x3]  ;;  %v33_v23 = vld [vmem:[%s694_s0 + $0x50] sm:$0xff]  ;;  %s537_s11 = smov [#allocation2]  }
   0xc   :  { %v469_v22 = vpack.c.bf16 %v32_v20, %v31_v19  ;;  %v34_v24 = vld [vmem:[%s694_s0 + $0x58] sm:$0xff]  ;;  %v35_v26 = vld [vmem:[%s694_s0 + $0x60] sm:$0xff]  ;;  %v36_v27 = vld [vmem:[%s694_s0 + $0x68] sm:$0xff]  ;;  %s341_s12 = sshll.u32 %s537_s11, 4  ;;  %s342_s12 = int_to_ptr.vmem [resolvable:$true] %s341_s12 }
   0xd   :  { %v475_v25 = vpack.c.bf16 %v34_v24, %v33_v23  ;;  %v481_v28 = vpack.c.bf16 %v36_v27, %v35_v26  ;;  %v37_v29 = vld [vmem:[%s694_s0 + $0x70] sm:$0xff]  ;;  %v38_v30 = vld [vmem:[%s694_s0 + $0x78] sm:$0xff]  ;;  %vm498_vm5 = vmpackc.low %vm260_vm3, %vm536_vm4  ;;  %s508_s13 = scalar_lea.vmem %s342_s12, 32  ;;  %p513_p1 = scmp.lt.s32.totalorder %s342_s12, %s342_s12 }
   0xe   :  { %456 = vmatpush3.bf16.xpose.msk.msra.mxu0 %vm579_vm1, %v451_v8  ;;  %50 = vperm.xlu1 %506, %v40_v16   ;;  %v487_v31 = vpack.c.bf16 %v38_v30, %v37_v29  ;;  %v41_v32 = vld [vmem:[%s696_s2 + $0x10] sm:$0xff]  ;;  %v249_v61 = vld [vmem:[%s697_s3] sm:$0x3]  ;;  %p509_p0 = scmp.ne.s32.totalorder %s342_s12, %s508_s13  ;;  %p514_p2 = scmp.lt.s32.totalorder %s508_s13, %s508_s13 }
   0xf   :  { %459 = vmatprep.subr.msk.bf16.mxu0 %vm579_vm1, %v457_v11 }
  0x10   :  { %p515_p3 = por %p514_p2, %p513_p1 }
  0x12   :  { %60 = vperm.xlu1 %506, %v42_v18   ;;  %p516_p4 = pnand %p515_p3, %p509_p0 }
  0x16   :  { %462 = vmatpush3.bf16.xpose.msk.msra.mxu0 %vm579_vm1, %v457_v11  ;;  %253 = vperm.xlu1 %506, %v250_v21  }
  0x17   :  { %465 = vmatprep.subr.msk.bf16.mxu0 %vm579_vm1, %v463_v17 }
  0x1e   :  { %468 = vmatpush3.bf16.xpose.msk.msra.mxu0 %vm579_vm1, %v463_v17 }
  0x1f   :  { %471 = vmatprep.subr.msk.bf16.mxu0 %vm579_vm1, %v469_v22 }
  0x26   :  { %474 = vmatpush3.bf16.xpose.msk.msra.mxu0 %vm579_vm1, %v469_v22 }
  0x27   :  { %477 = vmatprep.subr.msk.bf16.mxu0 %vm579_vm1, %v475_v25 }
  0x2e   :  { %480 = vmatpush3.bf16.xpose.msk.msra.mxu0 %vm579_vm1, %v475_v25 }
  0x2f   :  { %483 = vmatprep.subr.msk.bf16.mxu0 %vm579_vm1, %v481_v28  ;;  %507 = vset.pattern.permute.xlu0 %v532_v15 }
  0x36   :  { %486 = vmatpush3.bf16.xpose.msk.msra.mxu0 %vm579_vm1, %v481_v28 }
  0x37   :  { %489 = vmatprep.subr.msk.bf16.mxu0 %vm579_vm1, %v487_v31  ;;  %55 = vperm.xlu0 %507, %v41_v32  }
  0x3e   :  { %492 = vmatpush3.bf16.xpose.msk.msra.mxu0 %vm579_vm1, %v487_v31 }
  0x82   :  { %v79_v33 = vpop.trf.xlu0 }
  0x83   :  { %428 = vmatprep.mubr.msk.f32.mxu0 %vm95_vm0, %v79_v33 }
  0x86   :  { %v80_v34 = vpop.trf.xlu0 }
  0x87   :  { %429 = vmatmul.mubr.msk.f32.vlgmr.msra.gmra.mrb[0].mxu0 %vm95_vm0, %v80_v34 }
  0x89   :  { %v46_v39 = vpop.permute.xlu1 %45 }
  0x8a   :  { %v81_v35 = vpop.trf.xlu0 }
  0x8b   :  { %431 = vmatprep.mubr.msk.f32.mxu0 %vm95_vm0, %v81_v35 }
  0x8d   :  { %v51_v40 = vpop.permute.xlu1 %50 }
  0x8e   :  { %v82_v36 = vpop.trf.xlu0 }
  0x8f   :  { %432 = vmatmul.mubr.msk.f32.gmra.mrb[2].mxu0 %vm95_vm0, %v82_v36 }
  0x91   :  { %v61_v50 = vpop.permute.xlu1 %60 }
  0x95   :  { %v254_v62 = vpop.permute.xlu1 %253 }
  0xb6   :  { %v56_v49 = vpop.permute.xlu0 %55 }
 0x15a   :  { %v430_v41 = vpop.f32.mrb[0].mxu0 }
 0x15b   :  { %v228_v42 = vadd.f32 %v430_v41, %v51_v40  ;;  %v222_v43 = vpop.f32.mrb[1].mxu0 }
 0x15c   :  { %v223_v44 = vadd.f32 %v222_v43, %v46_v39 }
 0x15d   :  { %v242_v45 = vmul.f32 0.01, %v228_v42 }
 0x15e   :  { %v241_v46 = vmul.f32 0.01, %v223_v44 }
 0x15f   :  { %v246_v47 = vmax.f32 %v228_v42, %v242_v45 }
 0x160   :  { %v245_v48 = vmax.f32 %v223_v44, %v241_v46 }
 0x162   :  { %v433_v51 = vpop.f32.mrb[2].mxu0  ;;  %v494_v52 = vpack.c.bf16 %v246_v47, %v245_v48 }
 0x163   :  { %v238_v53 = vadd.f32 %v433_v51, %v61_v50  ;;  %v232_v54 = vpop.f32.mrb[3].mxu0 }
 0x164   :  { %v233_v55 = vadd.f32 %v232_v54, %v56_v49  ;;  %495 = vmatpush3.bf16.msra.mxu1 %v494_v52 }
 0x165   :  { %v244_v56 = vmul.f32 0.01, %v238_v53  ;;  %496 = vmatprep.subr.bf16.mxu1 %v533_v37 }
 0x166   :  { %v243_v57 = vmul.f32 0.01, %v233_v55 }
 0x167   :  { %v248_v58 = vmax.f32 %v238_v53, %v244_v56 }
 0x168   :  { %v247_v59 = vmax.f32 %v233_v55, %v243_v57 }
 0x16a   :  { %v497_v60 = vpack.c.bf16 %v248_v58, %v247_v59 }
 0x16c   :  { %499 = vmatpush3.bf16.msk.msra.mxu1 %vm498_vm5, %v497_v60 }
 0x16f   :  { %443 = vmatmul.mubr.msk.f32.vlgmr.msra.gmra.mrb[0].mxu1 %vm256_vm6, %v249_v61 }
 0x242   :  { %v330_v63 = vpop.f32.mrb[0].mxu1 }
 0x243   :  { %v331_v0 = vadd.f32 %v330_v63, %v254_v62  ;;  %v444_v1 = vpop.f32.mrb[1].mxu1 }
 0x245   :  { %334 = vst [vmem:[#allocation2] sm:$0x3] %v331_v0 }
 0x246   :  { %519 = shalt.err (!%p516_p4)
}
 0x247   :  { %s520_s3 = scalar_lea.hbm %s699_s5, 32 }
 0x248   :  { %p521_p5 = scmp.ne.s32.totalorder %s699_s5, %s520_s3  ;;  %p524_p6 = scmp.lt.u32.totalorder %s520_s3, %s699_s5 }
 0x24a   :  { %p526_p7 = pnand %p524_p6, %p521_p5 }
 0x24c   :  { %529 = shalt.err (!%p526_p7)
}
 0x24d   :  { %344 = dma.vmem_to_hbm [thread:$0]  %s342_s12, 32, %s699_s5, [#allocation3]  }
 0x24e   :  { %530 = dma.done.wait [#allocation3], 32  }
 0x24f   :  { %531 = vsyncadd [#allocation3], 4294967264 }
 0x250   :  { %348 = vsyncpa [#allocation3], 1 }

</bundles_post_ra>
